<compile_context>
chip_gen: v7x
topology: tpu7x:2x2x1
jax: 0.10.0
libtpu: 0.0.40
codegen_flags: <defaults>
</compile_context>

<pallas_src>
import jax
import jax.numpy as jnp
from jax.experimental import pallas as pl
from jax.experimental.pallas import tpu as pltpu


def _plistmle_weight_kernel(mask_ref, out_ref):
    # Mask arrives in its native dtype (bool / int8 / int32 / f32); convert in VMEM.
    m = mask_ref[...].astype(jnp.float32)                              # [TILE_B, N]
    # Per-row valid-doc count (cross-lane XLU reduction, hidden under DMA).
    num_docs = jnp.sum(m, axis=1, keepdims=True).astype(jnp.int32)     # [TILE_B, 1]
    ranks = jax.lax.broadcasted_iota(jnp.int32, m.shape, 1)            # [TILE_B, N]
    # Exact float32 2**e via the exponent bit field, e clamped to [-126, 128]:
    #   e <= -126 : 2**e - 1 rounds to -1.0 either way  -> clamp is exact
    #   e == 128  : exponent field 255 -> +inf, matching float32 overflow
    # TODO(synk): assumes a boolean / {0,1} mask (the module contract); a soft
    # (fractional) mask would need the transcendental exp2 path instead.
    e = jnp.clip(num_docs - ranks, -126, 128)
    pow2 = jax.lax.bitcast_convert_type((e + 127) << 23, jnp.float32)
    out_ref[...] = (pow2 - 1.0) * m


def _round_up(x, m):
    return ((x + m - 1) // m) * m


def _chip_budgets():
    """Per-generation (tile_budget_bytes, vmem_limit_bytes)."""
    vmem_cap = 64 * 1024 * 1024  # conservative default (v7x-class / unknown)
    try:
        vmem_cap = int(pltpu.get_tpu_info().vmem_capacity_bytes)
    except Exception:
        pass
    if vmem_cap >= 100 * 1024 * 1024:            # v5e / v6e: 128 MiB physical VMEM
        return 24 * 1024 * 1024, 64 * 1024 * 1024
    return 18 * 1024 * 1024, 48 * 1024 * 1024    # v7x: 64 MiB per TensorCore


def _plistmle_weight_reference(mask):
    """Pure-JAX form mirroring the PyTorch module (used as fallback + test ref)."""
    m = mask.astype(jnp.float32)
    num_docs = jnp.sum(m, axis=1, keepdims=True)
    ranks = jnp.arange(m.shape[1], dtype=jnp.float32)[None, :]
    return (jnp.power(2.0, num_docs - ranks) - 1.0) * m


def plistmle_lambda_weight_pallas(mask, *, tile_b=None, vmem_budget_bytes=None):
    """Position-aware ListMLE weights via a Pallas TPU kernel.

    Args:
        mask: [batch_size, num_docs] boolean (or {0,1} numeric) mask.
        tile_b: optional batch-tile override (rounded up to a multiple of 32).
        vmem_budget_bytes: optional override of the per-generation tile budget.

    Returns:
        float32 [batch_size, num_docs] weights.
    """
    B, N = mask.shape
    tile_budget, vmem_limit = _chip_budgets()
    if vmem_budget_bytes is not None:
        tile_budget = vmem_budget_bytes

    SUBLANE = 32                              # covers int8/bool packing; multiple of f32's 8
    padded_n = _round_up(N, 128)              # VMEM blocks are lane-padded to 128
    in_itemsize = jnp.dtype(mask.dtype).itemsize   # bool -> 1 byte
    # Double-buffered input + f32 output footprint per batch row, lane-padded.
    bytes_per_row = 2 * (in_itemsize + 4) * padded_n

    if tile_b is None:
        tile_b = max(SUBLANE, (tile_budget // bytes_per_row) // SUBLANE * SUBLANE)
        if B > SUBLANE:
            # Keep >= 2 grid steps so both v7x TensorCores get work
            # (negligible extra per-step overhead on single-TC v5e/v6e).
            tile_b = min(tile_b, _round_up(pl.cdiv(B, 2), SUBLANE))
    tile_b = _round_up(max(int(tile_b), 1), SUBLANE)
    tile_b = min(tile_b, _round_up(B, SUBLANE))

    # Pad batch so every grid step sees a full, aligned tile. Padded rows have an
    # all-zero mask -> finite weights * 0 -> 0, then sliced away below.
    B_pad = _round_up(B, tile_b)
    if B_pad != B:
        mask = jnp.pad(mask, ((0, B_pad - B), (0, 0)))

    out = pl.pallas_call(
        _plistmle_weight_kernel,
        out_shape=jax.ShapeDtypeStruct((B_pad, N), jnp.float32),
        grid=(B_pad // tile_b,),
        # Tile over batch only: the row-sum and rank iota need the full doc axis
        # (N equals the full array extent, so lane divisibility does not apply).
        in_specs=[pl.BlockSpec((tile_b, N), lambda i: (i, 0))],
        out_specs=pl.BlockSpec((tile_b, N), lambda i: (i, 0)),
        compiler_params=pltpu.CompilerParams(
            dimension_semantics=("parallel",),   # shards across v7x's 2 TCs
            vmem_limit_bytes=vmem_limit,
        ),
    )(mask)

    if B_pad != B:
        out = out[:B]
    return out
    # TODO(synk): if callers can consume a transposed [N, B] layout (batch on the
    # lane axis), a lane-dense variant would lift store lane utilization for
    # small N; kept [B, N] here to match the module contract.


def plistmle_lambda_weight(mask, *, tile_b=None, vmem_budget_bytes=None,
                           force_pallas=False):
    """Dispatching wrapper: tiny problems go to the fused pure-jnp path."""
    B, N = mask.shape
    if not force_pallas and B * N < (1 << 14):
        # pallas_call fixed overhead (~µs) would dominate; let XLA fuse it.
        return _plistmle_weight_reference(mask)
    return plistmle_lambda_weight_pallas(
        mask, tile_b=tile_b, vmem_budget_bytes=vmem_budget_bytes)


if __name__ == "__main__":
    key = jax.random.PRNGKey(0)

    # --- small shape consistent with the module: 2 queries x 8 docs ------------
    B, N = 2, 8
    valid = jax.random.randint(key, (B, 1), minval=1, maxval=N + 1)
    mask = jnp.arange(N)[None, :] < valid                      # bool [B, N]
    out = jax.block_until_ready(plistmle_lambda_weight(mask, force_pallas=True))
    ref = _plistmle_weight_reference(mask)
    assert out.shape == (B, N) and out.dtype == jnp.float32
    assert jnp.allclose(out, ref, rtol=1e-4, atol=1e-6), (out, ref)

    # --- multi-tile grid + batch-padding path (explicit tile_b) ----------------
    B2, N2 = 97, 40
    valid2 = jax.random.randint(jax.random.PRNGKey(0), (B2, 1), minval=0, maxval=N2 + 1)
    mask2 = jnp.arange(N2)[None, :] < valid2
    out2 = jax.block_until_ready(
        plistmle_lambda_weight(mask2, tile_b=32, force_pallas=True))
    ref2 = _plistmle_weight_reference(mask2)
    assert out2.shape == (B2, N2) and out2.dtype == jnp.float32
    assert jnp.allclose(out2, ref2, rtol=1e-4, atol=1e-6)

    # --- auto-sized tile path (lane-padded budget math, >=2 grid steps) --------
    B3, N3 = 384, 160
    valid3 = jax.random.randint(jax.random.PRNGKey(0), (B3, 1), minval=0, maxval=101)
    mask3 = jnp.arange(N3)[None, :] < valid3
    out3 = jax.block_until_ready(plistmle_lambda_weight(mask3, force_pallas=True))
    ref3 = _plistmle_weight_reference(mask3)
    assert out3.shape == (B3, N3) and out3.dtype == jnp.float32
    assert jnp.allclose(out3, ref3, rtol=1e-4, atol=1e-6)

    print("KERNEL_OK")
</pallas_src>

<mosaic_0001>
module attributes {stable_mosaic.version = 11 : i64} {
  func.func @_plistmle_weight_kernel(%arg0: i32, %arg1: memref<32x8xi32, #tpu.memory_space<vmem>>, %arg2: memref<32x8xf32, #tpu.memory_space<vmem>>) attributes {dimension_semantics = [#tpu.dimension_semantics<parallel>], iteration_bounds = array<i64: 1>, scalar_prefetch = 0 : i64, scratch_operands = 0 : i64, tpu.core_type = #tpu.core_type<tc>, window_params = [{transform_indices = @transform_0, window_bounds = array<i64: 32, 8>}, {transform_indices = @transform_1, window_bounds = array<i64: 32, 8>}]} {
    %c0 = arith.constant 0 : index
    %c0_0 = arith.constant 0 : index
    %0 = vector.load %arg1[%c0, %c0_0] : memref<32x8xi32, #tpu.memory_space<vmem>>, vector<32x8xi32>
    %cst = arith.constant dense<0> : vector<32x8xi32>
    %1 = arith.cmpi ne, %0, %cst : vector<32x8xi32>
    %2 = arith.extui %1 : vector<32x8xi1> to vector<32x8xi32>
    %3 = arith.sitofp %2 : vector<32x8xi32> to vector<32x8xf32>
    %cst_1 = arith.constant dense<0.000000e+00> : vector<32xf32>
    %4 = vector.multi_reduction <add>, %3, %cst_1 [1] : vector<32x8xf32> to vector<32xf32>
    %5 = vector.shape_cast %4 : vector<32xf32> to vector<32x1xf32>
    %6 = arith.fptosi %5 : vector<32x1xf32> to vector<32x1xi32>
    %7 = tpu.iota {dimensions = array<i32: 1>} : vector<32x8xi32>
    %8 = vector.broadcast %6 : vector<32x1xi32> to vector<32x8xi32>
    %9 = arith.subi %8, %7 : vector<32x8xi32>
    %c-126_i32 = arith.constant -126 : i32
    %c128_i32 = arith.constant 128 : i32
    %10 = vector.broadcast %c-126_i32 : i32 to vector<32x8xi32>
    %11 = arith.maxsi %10, %9 : vector<32x8xi32>
    %12 = vector.broadcast %c128_i32 : i32 to vector<32x8xi32>
    %13 = arith.minsi %12, %11 : vector<32x8xi32>
    %c127_i32 = arith.constant 127 : i32
    %14 = vector.broadcast %c127_i32 : i32 to vector<32x8xi32>
    %15 = arith.addi %13, %14 : vector<32x8xi32>
    %c23_i32 = arith.constant 23 : i32
    %16 = vector.broadcast %c23_i32 : i32 to vector<32x8xi32>
    %17 = arith.shli %15, %16 : vector<32x8xi32>
    %18 = tpu.bitcast %17 : vector<32x8xi32> -> vector<32x8xf32>
    %cst_2 = arith.constant 1.000000e+00 : f32
    %19 = vector.broadcast %cst_2 : f32 to vector<32x8xf32>
    %20 = arith.subf %18, %19 : vector<32x8xf32>
    %21 = arith.mulf %20, %3 : vector<32x8xf32>
    %c0_3 = arith.constant 0 : index
    %c0_4 = arith.constant 0 : index
    %22 = vector.load %arg2[%c0_3, %c0_4] : memref<32x8xf32, #tpu.memory_space<vmem>>, vector<32x8xf32>
    tpu.vector_store %arg2[%c0_3, %c0_4], %21 {strides = array<i32>} : memref<32x8xf32, #tpu.memory_space<vmem>>, vector<32x8xf32>,
    return
  }
  func.func @transform_0(%arg0: i32) -> (i32, i32) {
    %c0_i32 = arith.constant 0 : i32
    %c0_i32_0 = arith.constant 0 : i32
    return %arg0, %c0_i32 : i32, i32
  }
  func.func @transform_1(%arg0: i32) -> (i32, i32) {
    %c0_i32 = arith.constant 0 : i32
    %c0_i32_0 = arith.constant 0 : i32
    return %arg0, %c0_i32 : i32, i32
  }
}

</mosaic_0001>

<bundles_post_ra>
// kernel: tpu_custom_call.1
= control target key start
LH: loop header
LB: loop body
LE: loop exit
PB: predicated region body
PF: predicated region fallthrough
CT: control target
= control target key end

     0   :  { %vm24_vm0 = vcmask 64512   ;;  %v108_v4 = vmov 0.0   ;;  %v41_v13 = vlaneseq  ;;  %s151_s0 = inlined_call_operand.vmem [shape: s32[32,8], index: 0, kind: input, shape index: {}]   ;;  %s152_s1 = inlined_call_operand.vmem [shape: f32[32,8], index: 1, kind: output, shape index: {}]  }
   0x1   :  { %v10_v0 = vld [vmem:[%s151_s0 + $0x10] sm:$0xff]  ;;  %v8_v1 = vld [vmem:[%s151_s0] sm:$0xff]  ;;  %v11_v2 = vld [vmem:[%s151_s0 + $0x18] sm:$0xff] }
   0x2   :  { %vm14_vm1 = vcmp.ne.s32.totalorder %v10_v0, 0  ;;  %vm12_vm2 = vcmp.ne.s32.totalorder %v8_v1, 0  ;;  %vm15_vm3 = vcmp.ne.s32.totalorder %v11_v2, 0  ;;  %v9_v3 = vld [vmem:[%s151_s0 + $0x8] sm:$0xff]  ;;  %v42_v16 = vand.u32 127, %v41_v13 }
   0x3   :  { %v93_v5 = vsel %vm14_vm1, 1.0, %v108_v4  ;;  %v91_v6 = vsel %vm12_vm2, 1.0, %v108_v4  ;;  %v94_v7 = vsel %vm15_vm3, 1.0, %v108_v4  ;;  %vm13_vm4 = vcmp.ne.s32.totalorder %v9_v3, 0 }
   0x4   :  { %v31_v8 = vsel %vm24_vm0, %v93_v5, 0.0  ;;  %v25_v9 = vsel %vm24_vm0, %v91_v6, 0.0  ;;  %v92_v10 = vsel %vm13_vm4, 1.0, %v108_v4  ;;  %v34_v11 = vsel %vm24_vm0, %v94_v7, 0.0 }
   0x5   :  { %32 = vadd.xlane.f32.xlu1 %v31_v8  ;;  %26 = vadd.xlane.f32.xlu0 %v25_v9  ;;  %v28_v12 = vsel %vm24_vm0, %v92_v10, 0.0 }
   0x9   :  { %35 = vadd.xlane.f32.xlu1 %v34_v11  ;;  %29 = vadd.xlane.f32.xlu0 %v28_v12 }
  0x92   :  { %v33_v14 = vpop.xlane.xlu1 %32  ;;  %v27_v15 = vpop.xlane.xlu0 %26 }
  0x93   :  { %v103_v17 = vtrunc.f32 %v33_v14  ;;  %v99_v18 = vtrunc.f32 %v27_v15 }
  0x95   :  { %v104_v19 = vcvt.f32.s32 %v103_v17  ;;  %v100_v20 = vcvt.f32.s32 %v99_v18 }
  0x96   :  { %v36_v21 = vpop.xlane.xlu1 %35  ;;  %v30_v22 = vpop.xlane.xlu0 %29 }
  0x97   :  { %v45_v23 = vsub.s32 %v104_v19, %v42_v16  ;;  %v43_v24 = vsub.s32 %v100_v20, %v42_v16  ;;  %v105_v25 = vtrunc.f32 %v36_v21  ;;  %v101_v26 = vtrunc.f32 %v30_v22 }
  0x99   :  { %vm51_vm5 = vcmp.gt.s32.totalorder %v45_v23, 4294967170  ;;  %vm47_vm6 = vcmp.gt.s32.totalorder %v43_v24, 4294967170  ;;  %v106_v27 = vcvt.f32.s32 %v105_v25  ;;  %v102_v28 = vcvt.f32.s32 %v101_v26 }
  0x9a   :  { %v52_v29 = vsel %vm51_vm5, %v45_v23, 4294967170  ;;  %v48_v30 = vsel %vm47_vm6, %v43_v24, 4294967170 }
  0x9b   :  { %vm59_vm7 = vcmp.lt.s32.totalorder %v52_v29, 128  ;;  %vm55_vm8 = vcmp.lt.s32.totalorder %v48_v30, 128  ;;  %v46_v31 = vsub.s32 %v106_v27, %v42_v16  ;;  %v44_v32 = vsub.s32 %v102_v28, %v42_v16 }
  0x9c   :  { %v60_v33 = vsel %vm59_vm7, %v52_v29, 128  ;;  %v56_v34 = vsel %vm55_vm8, %v48_v30, 128 }
  0x9d   :  { %v65_v35 = vadd.s32 127, %v60_v33  ;;  %v63_v36 = vadd.s32 127, %v56_v34  ;;  %vm53_vm9 = vcmp.gt.s32.totalorder %v46_v31, 4294967170  ;;  %vm49_vm10 = vcmp.gt.s32.totalorder %v44_v32, 4294967170 }
  0x9e   :  { %v54_v37 = vsel %vm53_vm9, %v46_v31, 4294967170  ;;  %v50_v38 = vsel %vm49_vm10, %v44_v32, 4294967170 }
  0x9f   :  { %v69_v39 = vshll.u32 %v65_v35, 23  ;;  %v67_v40 = vshll.u32 %v63_v36, 23  ;;  %vm61_vm11 = vcmp.lt.s32.totalorder %v54_v37, 128  ;;  %vm57_vm12 = vcmp.lt.s32.totalorder %v50_v38, 128 }
  0xa0   :  { %v62_v41 = vsel %vm61_vm11, %v54_v37, 128  ;;  %v58_v42 = vsel %vm57_vm12, %v50_v38, 128 }
  0xa1   :  { %v97_v43 = vadd.f32 -1.0, %v69_v39  ;;  %v95_v44 = vadd.f32 -1.0, %v67_v40  ;;  %v66_v45 = vadd.s32 127, %v62_v41  ;;  %v64_v46 = vadd.s32 127, %v58_v42 }
  0xa3   :  { %v81_v47 = vmul.f32 %v97_v43, %v93_v5  ;;  %v79_v48 = vmul.f32 %v95_v44, %v91_v6  ;;  %v70_v49 = vshll.u32 %v66_v45, 23  ;;  %v68_v50 = vshll.u32 %v64_v46, 23 }
  0xa5   :  { %85 = vst.msk [vmem:[%s152_s1 + $0x10] sm:$0xff] %vm24_vm0, %v81_v47  ;;  %83 = vst.msk [vmem:[%s152_s1] sm:$0xff] %vm24_vm0, %v79_v48  ;;  %v98_v51 = vadd.f32 -1.0, %v70_v49  ;;  %v96_v52 = vadd.f32 -1.0, %v68_v50 }
  0xa7   :  { %v82_v53 = vmul.f32 %v98_v51, %v94_v7  ;;  %v80_v54 = vmul.f32 %v96_v52, %v92_v10 }
  0xa9   :  { %86 = vst.msk [vmem:[%s152_s1 + $0x18] sm:$0xff] %vm24_vm0, %v82_v53  ;;  %84 = vst.msk [vmem:[%s152_s1 + $0x8] sm:$0xff] %vm24_vm0, %v80_v54 }

</bundles_post_ra>
